<compile_context>
chip_gen: v5e
topology: v5e:2x2
jax: 0.10.0
libtpu: 0.0.40
codegen_flags: <defaults>
</compile_context>

<pallas_src>
import functools
import math

import jax
import jax.numpy as jnp
from jax.experimental import pallas as pl
from jax.experimental.pallas import tpu as pltpu


_TILE_TARGET_BYTES = 2 << 20    # ~2 MiB x-tile per grid step (review: 2-4 MiB)
_VMEM_LIMIT_BYTES = 32 << 20    # explicit scoped-VMEM limit, safe on v5e/v6e/v7x


# ----------------------------------------------------------------------------
# Buffer setup (plain JAX glue, mirrors PositionalEncoding.__init__).
# Build pe once, in the model dtype, at init time (hoisted out of the forward).
# ----------------------------------------------------------------------------
def make_positional_encoding(max_len: int, d_model: int,
                             dtype=jnp.float32) -> jnp.ndarray:
    """Returns pe of shape (max_len, d_model); torch stores (max_len, 1, d_model)."""
    position = jnp.arange(0, max_len, dtype=jnp.float32)[:, None]            # (max_len, 1)
    div_term = jnp.exp(
        jnp.arange(0, d_model, 2, dtype=jnp.float32) * (-math.log(10000.0) / d_model)
    )                                                                         # (ceil(d/2),)
    pe = jnp.zeros((max_len, d_model), dtype=jnp.float32)
    pe = pe.at[:, 0::2].set(jnp.sin(position * div_term))
    pe = pe.at[:, 1::2].set(jnp.cos(position * div_term[: d_model // 2]))     # odd-d safe
    return pe.astype(dtype)


# ----------------------------------------------------------------------------
# Tile sizing
# ----------------------------------------------------------------------------
def _round_up(x: int, m: int) -> int:
    return ((x + m - 1) // m) * m


def _pick_tile_s(seq_len: int, row_bytes: int, itemsize: int) -> int:
    # dtype-aware sublane granularity: 8 rows for 32-bit, 16 bf16, 32 int8/fp8.
    sub = 8 * max(1, 4 // max(1, itemsize))
    budget = max(sub, ((_TILE_TARGET_BYTES // max(1, row_bytes)) // sub) * sub)
    ts = min(budget, _round_up(seq_len, sub))
    # Prefer >= 2 grid steps so ("parallel",) can split the S axis across
    # v7x's two TensorCores (neutral on v5e/v6e).
    if seq_len > sub and ts >= seq_len:
        ts = max(sub, _round_up((seq_len + 1) // 2, sub))
    return ts


# ----------------------------------------------------------------------------
# Kernels
# ----------------------------------------------------------------------------
def _pe_add_3d_kernel(x_ref, pe_ref, o_ref):
    # x_ref / o_ref: (TS, B, D), pe_ref: (TS, D) -> broadcast add along batch.
    # Only TS*D of pe is read from HBM per step (no duplication).
    o_ref[...] = (x_ref[...] + pe_ref[...][:, None, :]).astype(o_ref.dtype)


def _pe_add_flat_kernel(x_ref, pe_ref, o_ref, *, reps):
    # x_ref / o_ref: (TS, B*D), pe_ref: (TS, D).  pe is tiled along the lane
    # axis in VMEM (VPU/XLU work, free under the HBM bound); flattened x2[s, b*D+d]
    # lines up with tile(pe)[s, b*D+d] == pe[s, d].
    o_ref[...] = (x_ref[...] + jnp.tile(pe_ref[...], (1, reps))).astype(o_ref.dtype)


def _pe_add_dropout_3d_kernel(x_ref, pe_ref, m_ref, o_ref):
    # m_ref holds the pre-scaled keep mask: 1/(1-p) where kept, 0 where dropped.
    y = x_ref[...] + pe_ref[...][:, None, :]
    o_ref[...] = (y * m_ref[...]).astype(o_ref.dtype)


def _pe_add_dropout_flat_kernel(x_ref, pe_ref, m_ref, o_ref, *, reps):
    y = x_ref[...] + jnp.tile(pe_ref[...], (1, reps))
    o_ref[...] = (y * m_ref[...]).astype(o_ref.dtype)


# ----------------------------------------------------------------------------
# Wrapper
# ----------------------------------------------------------------------------
def positional_encoding_forward(x, pe, *, p: float = 0.1,
                                training: bool = False, rng_key=None):
    """Forward of PositionalEncoding. x: (S, B, D), pe: (max_len, D)."""
    S, B, D = x.shape
    assert pe.shape[0] >= S and pe.shape[1] == D, "pe must cover (max_len >= S, D)"
    if pe.dtype != x.dtype:
        # Small (max_len, D) cast; ideally hoisted to init via
        # make_positional_encoding(dtype=x.dtype).
        pe = pe.astype(x.dtype)

    itemsize = x.dtype.itemsize
    use_3d = (D % 128 == 0)              # lane-dense already; broadcast pe in-kernel
    dropout = training and p > 0.0

    ts = _pick_tile_s(S, B * D * itemsize, itemsize)
    grid = (pl.cdiv(S, ts),)
    cparams = pltpu.CompilerParams(
        dimension_semantics=("parallel",),
        vmem_limit_bytes=_VMEM_LIMIT_BYTES)

    if dropout:
        # TODO(synk): torch's dropout RNG stream cannot be reproduced; the mask
        # is drawn with jax.random in the wrapper (instead of the TPU hardware
        # PRNG, which has no interpret/CPU lowering), costing one extra HBM
        # input stream in training mode only.
        if rng_key is None:
            rng_key = jax.random.PRNGKey(0)
        keep = jax.random.bernoulli(rng_key, 1.0 - float(p), (S, B, D))
        mask = jnp.where(keep,
                         jnp.asarray(1.0 / (1.0 - float(p)), x.dtype),
                         jnp.asarray(0.0, x.dtype))

    n_big_streams = (3 if dropout else 2) + 1          # x(+mask) in, out
    cost = pl.CostEstimate(
        flops=int((2 if dropout else 1) * S * B * D),
        transcendentals=0,
        bytes_accessed=int((n_big_streams - 1) * S * B * D * itemsize
                           + S * D * itemsize))

    pe_spec = pl.BlockSpec((ts, D), lambda i: (i, 0))

    if use_3d:
        x_spec = pl.BlockSpec((ts, B, D), lambda i: (i, 0, 0))
        o_spec = pl.BlockSpec((ts, B, D), lambda i: (i, 0, 0))
        if dropout:
            return pl.pallas_call(
                _pe_add_dropout_3d_kernel,
                out_shape=jax.ShapeDtypeStruct((S, B, D), x.dtype),
                grid_spec=pltpu.PrefetchScalarGridSpec(
                    num_scalar_prefetch=0, grid=grid,
                    in_specs=[x_spec, pe_spec,
                              pl.BlockSpec((ts, B, D), lambda i: (i, 0, 0))],
                    out_specs=o_spec),
                compiler_params=cparams, cost_estimate=cost,
            )(x, pe, mask)
        return pl.pallas_call(
            _pe_add_3d_kernel,
            out_shape=jax.ShapeDtypeStruct((S, B, D), x.dtype),
            grid_spec=pltpu.PrefetchScalarGridSpec(
                num_scalar_prefetch=0, grid=grid,
                in_specs=[x_spec, pe_spec], out_specs=o_spec),
            compiler_params=cparams, cost_estimate=cost,
        )(x, pe)

    # Narrow / unaligned D: flatten (S, B, D) -> (S, B*D) (contiguous reshape)
    # so lanes are as dense as the shape allows; pe stays (max_len, D) and is
    # tiled along lanes inside the kernel (no pe duplication in HBM).
    x2 = x.reshape(S, B * D)
    x_spec = pl.BlockSpec((ts, B * D), lambda i: (i, 0))
    o_spec = pl.BlockSpec((ts, B * D), lambda i: (i, 0))
    if dropout:
        m2 = mask.reshape(S, B * D)
        out2 = pl.pallas_call(
            functools.partial(_pe_add_dropout_flat_kernel, reps=B),
            out_shape=jax.ShapeDtypeStruct((S, B * D), x.dtype),
            grid_spec=pltpu.PrefetchScalarGridSpec(
                num_scalar_prefetch=0, grid=grid,
                in_specs=[x_spec, pe_spec,
                          pl.BlockSpec((ts, B * D), lambda i: (i, 0))],
                out_specs=o_spec),
            compiler_params=cparams, cost_estimate=cost,
        )(x2, pe, m2)
        return out2.reshape(S, B, D)

    out2 = pl.pallas_call(
        functools.partial(_pe_add_flat_kernel, reps=B),
        out_shape=jax.ShapeDtypeStruct((S, B * D), x.dtype),
        grid_spec=pltpu.PrefetchScalarGridSpec(
            num_scalar_prefetch=0, grid=grid,
            in_specs=[x_spec, pe_spec], out_specs=o_spec),
        compiler_params=cparams, cost_estimate=cost,
    )(x2, pe)
    return out2.reshape(S, B, D)


# ----------------------------------------------------------------------------
# Main
# ----------------------------------------------------------------------------
if __name__ == "__main__":
    MAX_LEN = 5000  # module default

    key = jax.random.PRNGKey(0)
    k1, k2, k3 = jax.random.split(key, 3)

    # ---- case 1: narrow d_model (< 128 lanes) -> flattened path.
    S, B, D = 8, 2, 32
    x = jax.random.normal(k1, (S, B, D), dtype=jnp.float32)
    pe = make_positional_encoding(MAX_LEN, D, dtype=jnp.float32)

    out = jax.block_until_ready(positional_encoding_forward(x, pe, p=0.1, training=False))
    ref = x + pe[:S, :][:, None, :]
    assert out.shape == (S, B, D) and out.dtype == jnp.float32
    assert jnp.allclose(out, ref, atol=1e-6, rtol=1e-6), "eval (narrow D) mismatch"

    # ---- case 2: D % 128 == 0 -> 3-D broadcast path, >= 2 grid steps.
    S2, B2, D2 = 16, 8, 128
    x_w = jax.random.normal(k2, (S2, B2, D2), dtype=jnp.float32)
    pe_w = make_positional_encoding(MAX_LEN, D2)
    out_w = jax.block_until_ready(positional_encoding_forward(x_w, pe_w, p=0.1, training=False))
    ref_w = x_w + pe_w[:S2, :][:, None, :]
    assert out_w.shape == (S2, B2, D2)
    assert jnp.allclose(out_w, ref_w, atol=1e-6, rtol=1e-6), "eval (wide D) mismatch"

    # ---- training-mode dropout: every element must be 0 (dropped) or the
    # correctly scaled (x + pe) value (kept).
    p = 0.25
    out_tr = jax.block_until_ready(
        positional_encoding_forward(x, pe, p=p, training=True, rng_key=k3))
    scaled = ref / (1.0 - p)
    elem_ok = jnp.isclose(out_tr, 0.0, atol=1e-6) | jnp.isclose(
        out_tr, scaled, atol=1e-5, rtol=1e-5)
    assert out_tr.shape == (S, B, D)
    assert bool(jnp.all(elem_ok)), "training output must be 0 or scaled (x+pe)"

    print("KERNEL_OK")
</pallas_src>

<mosaic_0001>
module attributes {stable_mosaic.version = 11 : i64} {
  func.func @_pe_add_flat_kernel(%arg0: i32, %arg1: memref<8x64xf32, #tpu.memory_space<vmem>>, %arg2: memref<8x32xf32, #tpu.memory_space<vmem>>, %arg3: memref<8x64xf32, #tpu.memory_space<vmem>>) attributes {dimension_semantics = [#tpu.dimension_semantics<parallel>], iteration_bounds = array<i64: 1>, scalar_prefetch = 0 : i64, scratch_operands = 0 : i64, tpu.core_type = #tpu.core_type<tc>, window_params = [{transform_indices = @transform_0, window_bounds = array<i64: 8, 64>}, {transform_indices = @transform_1, window_bounds = array<i64: 8, 32>}, {transform_indices = @transform_2, window_bounds = array<i64: 8, 64>}]} {
    %c0 = arith.constant 0 : index
    %c0_0 = arith.constant 0 : index
    %0 = vector.load %arg1[%c0, %c0_0] : memref<8x64xf32, #tpu.memory_space<vmem>>, vector<8x64xf32>
    %c0_1 = arith.constant 0 : index
    %c0_2 = arith.constant 0 : index
    %1 = vector.load %arg2[%c0_1, %c0_2] : memref<8x32xf32, #tpu.memory_space<vmem>>, vector<8x32xf32>
    %2 = tpu.concatenate %1, %1 in 1 : vector<8x32xf32>, vector<8x32xf32> -> vector<8x64xf32>
    %3 = arith.addf %0, %2 : vector<8x64xf32>
    %c0_3 = arith.constant 0 : index
    %c0_4 = arith.constant 0 : index
    %4 = vector.load %arg3[%c0_3, %c0_4] : memref<8x64xf32, #tpu.memory_space<vmem>>, vector<8x64xf32>
    tpu.vector_store %arg3[%c0_3, %c0_4], %3 {strides = array<i32>} : memref<8x64xf32, #tpu.memory_space<vmem>>, vector<8x64xf32>,
    return
  }
  func.func @transform_0(%arg0: i32) -> (i32, i32) {
    %c0_i32 = arith.constant 0 : i32
    %c0_i32_0 = arith.constant 0 : i32
    return %arg0, %c0_i32 : i32, i32
  }
  func.func @transform_1(%arg0: i32) -> (i32, i32) {
    %c0_i32 = arith.constant 0 : i32
    %c0_i32_0 = arith.constant 0 : i32
    return %arg0, %c0_i32 : i32, i32
  }
  func.func @transform_2(%arg0: i32) -> (i32, i32) {
    %c0_i32 = arith.constant 0 : i32
    %c0_i32_0 = arith.constant 0 : i32
    return %arg0, %c0_i32 : i32, i32
  }
}

</mosaic_0001>

<bundles_post_ra>
// kernel: tpu_custom_call.1
= control target key start
LH: loop header
LB: loop body
LE: loop exit
PB: predicated region body
PF: predicated region fallthrough
CT: control target
= control target key end

     0   :  { %s93_s0 = inlined_call_operand.vmem [shape: f32[8,64], index: 0, kind: input, shape index: {}]   ;;  %s94_s1 = inlined_call_operand.vmem [shape: f32[5000,32], index: 1, kind: input, shape index: {}]   ;;  %s95_s2 = inlined_call_operand.hbm [shape: f32[8,64], index: 2, kind: output, shape index: {}]  }
   0x1   :  { %v13_v0 = vld [vmem:[%s94_s1] sm:$0xff] }
   0x2   :  { %7 = vsyncpa [#allocation3], 0  ;;  %s67_s11 = smov 32   ;;  %vm18_vm0 = vcmask 261120   ;;  %v12_v1 = vld [vmem:[%s93_s0] sm:$0xff]  ;;  %s68_s14 = smov [#allocation2]  }
   0x3   :  { %15 = vrot.lane.b32.xlu0 %v13_v0, %s67_s11  ;;  %s28_s15 = sshll.u32 %s68_s14, 4  ;;  %s30_s18 = sshll.u32 %s95_s2, 4  ;;  %vm21_vm1 = vcmask 523264   ;;  %s29_s15 = int_to_ptr.vmem [resolvable:$true] %s28_s15  ;;  %s31_s18 = int_to_ptr.hbm [resolvable:$true] %s30_s18 }
  0x75   :  { %v16_v2 = vpop.permute.xlu0 %15 }
  0x76   :  { %v19_v3 = vsel %vm18_vm0, %v13_v0, %v16_v2 }
  0x77   :  { %v20_v4 = vadd.f32 %v19_v3, %v12_v1 }
  0x79   :  { %22 = vst.msk [vmem:[#allocation2] sm:$0xff] %vm21_vm1, %v20_v4 }
  0x7a   :  { %33 = dma.vmem_to_hbm [thread:$0]  %s29_s15, 128, %s31_s18, [#allocation3]  }
  0x7b   :  { %65 = dma.done.wait [#allocation3], 128  }
  0x7c   :  { %66 = vsyncadd [#allocation3], 4294967168 }
  0x7d   :  { %38 = vsyncpa [#allocation3], 1 }

</bundles_post_ra>
